<compile_context>
chip_gen: v7x
topology: tpu7x:2x2x1
jax: 0.10.0
libtpu: 0.0.40
codegen_flags: <defaults>
</compile_context>

<pallas_src>
import jax
import jax.numpy as jnp
from jax.experimental import pallas as pl
from jax.experimental.pallas import tpu as pltpu


def _attn_norm_kernel(a_ref, bT_ref, out_ref):
    # a_ref  : (TILE_I, M)        per-row-i score contributions
    # bT_ref : (M, TILE_J)        per-row-j score contributions (lane-dense)
    # out_ref: (M, TILE_I, TILE_J) normalized attention weights (lane-dense)
    a = a_ref[...]
    bT = bT_ref[...]
    num_meta = bT.shape[0]          # static (e.g. 4) -> fully unrolled below

    # Per meta-path plane: score[i, j] = a[i, m] + b[j, m]; exp(relu(.)).
    # NOTE: exp(relu(x)) without max-subtraction matches the PyTorch module
    # exactly (scores > ~88 would overflow there too).
    planes = []
    for m in range(num_meta):
        s = a[:, m:m + 1] + bT[m:m + 1, :]          # (TILE_I, TILE_J)
        planes.append(jnp.exp(jnp.maximum(s, 0.0)))

    # Denominator: unrolled VPU add over the M planes (no cross-lane reduce).
    denom = planes[0]
    for m in range(1, num_meta):
        denom = denom + planes[m]

    # EUP approximate reciprocal + one Newton-Raphson step for f32 accuracy.
    inv = pl.reciprocal(denom, approx=True)
    inv = inv * (2.0 - denom * inv)

    for m in range(num_meta):
        out_ref[m] = planes[m] * inv


def _pick_tile(n, cap, align):
    """Largest tile t with t == n, or (t <= cap, t % align == 0, n % t == 0)."""
    if n <= cap:
        return n
    t = (cap // align) * align
    while t >= align:
        if n % t == 0:
            return t
        t -= align
    return n  # fall back to the full extent


def attention_network_forward(f_meta, w_full, *, tile_i=None, tile_j=None):
    """f_meta: (N, D) f32; w_full: (2*D, M) f32 (stacked per-meta-path weights).

    Returns (N, N, M) f32, identical to the PyTorch module's output layout.
    """
    N, D = f_meta.shape
    assert w_full.shape[0] == 2 * D
    M = w_full.shape[1]

    # Hoist the tiny projections out of the grid (plain JAX / XLA matmuls).
    wa = w_full[:D, :]                               # applied to f_meta[i]
    wb = w_full[D:, :]                               # applied to f_meta[j]
    a = (f_meta @ wa).astype(jnp.float32)            # (N, M)
    bT = (f_meta @ wb).T.astype(jnp.float32)         # (M, N)  lane-dense over j

    # Tile selection: output block is (M, tile_i, tile_j) f32, double-buffered.
    # Caps keep 2 * M * tile_i * tile_j * 4 bytes ~= 16 MiB for M=4, which fits
    # comfortably on v5e/v6e (128 MiB VMEM) and v7x (64 MiB VMEM).
    if tile_i is None:
        tile_i = _pick_tile(N, 512, 8)
    if tile_j is None:
        tile_j = _pick_tile(N, 1024, 128)
    assert N % tile_i == 0 and N % tile_j == 0

    grid = (N // tile_i, N // tile_j)

    out_mnn = pl.pallas_call(
        _attn_norm_kernel,
        out_shape=jax.ShapeDtypeStruct((M, N, N), jnp.float32),
        grid_spec=pltpu.PrefetchScalarGridSpec(
            num_scalar_prefetch=0,
            grid=grid,
            in_specs=[
                pl.BlockSpec((tile_i, M), lambda i, j: (i, 0)),      # a rows
                pl.BlockSpec((M, tile_j), lambda i, j: (0, j)),      # bT cols
            ],
            out_specs=pl.BlockSpec((M, tile_i, tile_j), lambda i, j: (0, i, j)),
        ),
        compiler_params=pltpu.CompilerParams(
            dimension_semantics=("parallel", "parallel"),
            vmem_limit_bytes=40 * 1024 * 1024,
        ),
    )(a, bT)

    # Back to the PyTorch module's (N, N, M) axis order (cheap XLA transpose).
    return jnp.transpose(out_mnn, (1, 2, 0))


def _reference(f_meta, w_full):
    # Pure-JAX reference mirroring the PyTorch double loop.
    D = f_meta.shape[1]
    wa, wb = w_full[:D, :], w_full[D:, :]
    a = f_meta @ wa                                   # (N, M)
    b = f_meta @ wb                                   # (N, M)
    scores = a[:, None, :] + b[None, :, :]            # (N, N, M)
    e = jnp.exp(jnp.maximum(scores, 0.0))
    return e / jnp.sum(e, axis=-1, keepdims=True)


if __name__ == "__main__":
    # Small shapes consistent with the module: N nodes, input_dim features,
    # num_meta_paths attention heads over meta-paths.  N=128 keeps the lane
    # axis fully dense while still being a small problem.
    N = 128
    input_dim = 16
    num_meta_paths = 4

    key = jax.random.PRNGKey(0)
    k_feat, k_w = jax.random.split(key)

    f_meta = jax.random.normal(k_feat, (N, input_dim), dtype=jnp.float32)

    # nn.ParameterList of num_meta_paths tensors of shape (2*input_dim, 1),
    # stacked into a single (2*D, M) matrix.
    w_full = jax.random.normal(k_w, (2 * input_dim, num_meta_paths), dtype=jnp.float32)

    # tile_i=64 exercises a multi-step (2, 1) grid even at this small N.
    out = attention_network_forward(f_meta, w_full, tile_i=64)
    out = jax.block_until_ready(out)

    ref = _reference(f_meta, w_full)
    assert out.shape == (N, N, num_meta_paths)
    assert jnp.allclose(out, ref, atol=1e-5, rtol=1e-5), "mismatch vs reference"

    print("KERNEL_OK")
</pallas_src>

<mosaic_0001>
module attributes {stable_mosaic.version = 11 : i64} {
  func.func @_attn_norm_kernel(%arg0: i32, %arg1: i32, %arg2: memref<64x4xf32, #tpu.memory_space<vmem>>, %arg3: memref<4x128xf32, #tpu.memory_space<vmem>>, %arg4: memref<4x64x128xf32, #tpu.memory_space<vmem>>) attributes {dimension_semantics = [#tpu.dimension_semantics<parallel>, #tpu.dimension_semantics<parallel>], iteration_bounds = array<i64: 2, 1>, scalar_prefetch = 0 : i64, scratch_operands = 0 : i64, tpu.core_type = #tpu.core_type<tc>, window_params = [{transform_indices = @transform_0, window_bounds = array<i64: 64, 4>}, {transform_indices = @transform_1, window_bounds = array<i64: 4, 128>}, {transform_indices = @transform_2, window_bounds = array<i64: 4, 64, 128>}]} {
    %c0 = arith.constant 0 : index
    %c0_0 = arith.constant 0 : index
    %0 = vector.load %arg2[%c0, %c0_0] : memref<64x4xf32, #tpu.memory_space<vmem>>, vector<64x4xf32>
    %c0_1 = arith.constant 0 : index
    %c0_2 = arith.constant 0 : index
    %1 = vector.load %arg3[%c0_1, %c0_2] : memref<4x128xf32, #tpu.memory_space<vmem>>, vector<4x128xf32>
    %2 = vector.extract_strided_slice %0 {offsets = [0, 0], sizes = [64, 1], strides = [1, 1]} : vector<64x4xf32> to vector<64x1xf32>
    %3 = vector.extract_strided_slice %1 {offsets = [0, 0], sizes = [1, 128], strides = [1, 1]} : vector<4x128xf32> to vector<1x128xf32>
    %4 = vector.broadcast %2 : vector<64x1xf32> to vector<64x128xf32>
    %5 = vector.broadcast %3 : vector<1x128xf32> to vector<64x128xf32>
    %6 = arith.addf %4, %5 : vector<64x128xf32>
    %cst = arith.constant 0.000000e+00 : f32
    %7 = vector.broadcast %cst : f32 to vector<64x128xf32>
    %8 = arith.maximumf %6, %7 : vector<64x128xf32>
    %9 = math.exp %8 : vector<64x128xf32>
    %10 = vector.extract_strided_slice %0 {offsets = [0, 1], sizes = [64, 1], strides = [1, 1]} : vector<64x4xf32> to vector<64x1xf32>
    %11 = vector.extract_strided_slice %1 {offsets = [1, 0], sizes = [1, 128], strides = [1, 1]} : vector<4x128xf32> to vector<1x128xf32>
    %12 = vector.broadcast %10 : vector<64x1xf32> to vector<64x128xf32>
    %13 = vector.broadcast %11 : vector<1x128xf32> to vector<64x128xf32>
    %14 = arith.addf %12, %13 : vector<64x128xf32>
    %cst_3 = arith.constant 0.000000e+00 : f32
    %15 = vector.broadcast %cst_3 : f32 to vector<64x128xf32>
    %16 = arith.maximumf %14, %15 : vector<64x128xf32>
    %17 = math.exp %16 : vector<64x128xf32>
    %18 = vector.extract_strided_slice %0 {offsets = [0, 2], sizes = [64, 1], strides = [1, 1]} : vector<64x4xf32> to vector<64x1xf32>
    %19 = vector.extract_strided_slice %1 {offsets = [2, 0], sizes = [1, 128], strides = [1, 1]} : vector<4x128xf32> to vector<1x128xf32>
    %20 = vector.broadcast %18 : vector<64x1xf32> to vector<64x128xf32>
    %21 = vector.broadcast %19 : vector<1x128xf32> to vector<64x128xf32>
    %22 = arith.addf %20, %21 : vector<64x128xf32>
    %cst_4 = arith.constant 0.000000e+00 : f32
    %23 = vector.broadcast %cst_4 : f32 to vector<64x128xf32>
    %24 = arith.maximumf %22, %23 : vector<64x128xf32>
    %25 = math.exp %24 : vector<64x128xf32>
    %26 = vector.extract_strided_slice %0 {offsets = [0, 3], sizes = [64, 1], strides = [1, 1]} : vector<64x4xf32> to vector<64x1xf32>
    %27 = vector.extract_strided_slice %1 {offsets = [3, 0], sizes = [1, 128], strides = [1, 1]} : vector<4x128xf32> to vector<1x128xf32>
    %28 = vector.broadcast %26 : vector<64x1xf32> to vector<64x128xf32>
    %29 = vector.broadcast %27 : vector<1x128xf32> to vector<64x128xf32>
    %30 = arith.addf %28, %29 : vector<64x128xf32>
    %cst_5 = arith.constant 0.000000e+00 : f32
    %31 = vector.broadcast %cst_5 : f32 to vector<64x128xf32>
    %32 = arith.maximumf %30, %31 : vector<64x128xf32>
    %33 = math.exp %32 : vector<64x128xf32>
    %34 = arith.addf %9, %17 : vector<64x128xf32>
    %35 = arith.addf %34, %25 : vector<64x128xf32>
    %36 = arith.addf %35, %33 : vector<64x128xf32>
    %37 = tpu.reciprocal %36 {approx = true} : vector<64x128xf32> -> vector<64x128xf32>
    %38 = arith.mulf %36, %37 : vector<64x128xf32>
    %cst_6 = arith.constant 2.000000e+00 : f32
    %39 = vector.broadcast %cst_6 : f32 to vector<64x128xf32>
    %40 = arith.subf %39, %38 : vector<64x128xf32>
    %41 = arith.mulf %37, %40 : vector<64x128xf32>
    %42 = arith.mulf %9, %41 : vector<64x128xf32>
    %c0_7 = arith.constant 0 : index
    %c0_8 = arith.constant 0 : index
    %c0_9 = arith.constant 0 : index
    %43 = vector.load %arg4[%c0_7, %c0_8, %c0_9] : memref<4x64x128xf32, #tpu.memory_space<vmem>>, vector<1x64x128xf32>
    %44 = vector.shape_cast %43 : vector<1x64x128xf32> to vector<64x128xf32>
    %45 = vector.shape_cast %42 : vector<64x128xf32> to vector<1x64x128xf32>
    tpu.vector_store %arg4[%c0_7, %c0_8, %c0_9], %45 {strides = array<i32>} : memref<4x64x128xf32, #tpu.memory_space<vmem>>, vector<1x64x128xf32>,
    %46 = arith.mulf %17, %41 : vector<64x128xf32>
    %c1 = arith.constant 1 : index
    %c0_10 = arith.constant 0 : index
    %c0_11 = arith.constant 0 : index
    %47 = vector.load %arg4[%c1, %c0_10, %c0_11] : memref<4x64x128xf32, #tpu.memory_space<vmem>>, vector<1x64x128xf32>
    %48 = vector.shape_cast %47 : vector<1x64x128xf32> to vector<64x128xf32>
    %49 = vector.shape_cast %46 : vector<64x128xf32> to vector<1x64x128xf32>
    tpu.vector_store %arg4[%c1, %c0_10, %c0_11], %49 {strides = array<i32>} : memref<4x64x128xf32, #tpu.memory_space<vmem>>, vector<1x64x128xf32>,
    %50 = arith.mulf %25, %41 : vector<64x128xf32>
    %c2 = arith.constant 2 : index
    %c0_12 = arith.constant 0 : index
    %c0_13 = arith.constant 0 : index
    %51 = vector.load %arg4[%c2, %c0_12, %c0_13] : memref<4x64x128xf32, #tpu.memory_space<vmem>>, vector<1x64x128xf32>
    %52 = vector.shape_cast %51 : vector<1x64x128xf32> to vector<64x128xf32>
    %53 = vector.shape_cast %50 : vector<64x128xf32> to vector<1x64x128xf32>
    tpu.vector_store %arg4[%c2, %c0_12, %c0_13], %53 {strides = array<i32>} : memref<4x64x128xf32, #tpu.memory_space<vmem>>, vector<1x64x128xf32>,
    %54 = arith.mulf %33, %41 : vector<64x128xf32>
    %c3 = arith.constant 3 : index
    %c0_14 = arith.constant 0 : index
    %c0_15 = arith.constant 0 : index
    %55 = vector.load %arg4[%c3, %c0_14, %c0_15] : memref<4x64x128xf32, #tpu.memory_space<vmem>>, vector<1x64x128xf32>
    %56 = vector.shape_cast %55 : vector<1x64x128xf32> to vector<64x128xf32>
    %57 = vector.shape_cast %54 : vector<64x128xf32> to vector<1x64x128xf32>
    tpu.vector_store %arg4[%c3, %c0_14, %c0_15], %57 {strides = array<i32>} : memref<4x64x128xf32, #tpu.memory_space<vmem>>, vector<1x64x128xf32>,
    return
  }
  func.func @transform_0(%arg0: i32, %arg1: i32) -> (i32, i32) {
    %c0_i32 = arith.constant 0 : i32
    %c0_i32_0 = arith.constant 0 : i32
    return %arg0, %c0_i32 : i32, i32
  }
  func.func @transform_1(%arg0: i32, %arg1: i32) -> (i32, i32) {
    %c0_i32 = arith.constant 0 : i32
    %c0_i32_0 = arith.constant 0 : i32
    return %c0_i32, %arg1 : i32, i32
  }
  func.func @transform_2(%arg0: i32, %arg1: i32) -> (i32, i32, i32) {
    %c0_i32 = arith.constant 0 : i32
    %c0_i32_0 = arith.constant 0 : i32
    return %c0_i32, %arg0, %arg1 : i32, i32, i32
  }
}

</mosaic_0001>

<bundles_post_ra>
// kernel: tpu_custom_call.1
= control target key start
LH: loop header
LB: loop body
LE: loop exit
PB: predicated region body
PF: predicated region fallthrough
CT: control target
= control target key end

     0   :  { %7 = vsyncpa [#allocation3], 0  ;;  %s1302_s0 = inlined_call_operand.vmem [shape: f32[128,4], index: 0, kind: input, shape index: {}]   ;;  %s1303_s1 = inlined_call_operand.vmem [shape: f32[4,128], index: 1, kind: input, shape index: {}]   ;;  %s1304_s2 = inlined_call_operand.hbm [shape: f32[4,128,128], index: 2, kind: output, shape index: {}]  }
   0x1   :  { %9 = vsyncpa [#allocation3 + $0x1], 0  ;;  %s994_s9 = smov 0   ;;  %s996_s10 = smov 0  }
   0x2   :  { %s998_s11 = smov 0   ;;  %s1000_s12 = smov 0  }
   0x3   :  { %s1002_s13 = smov 0   ;;  %s1004_s14 = smov 0  }
   0x4 LB: > { %s719_s15 = sadd.s32 4294967295, %s967_s14   ;;  %s720_s16 = sadd.s32 4294967294, %s967_s14   ;;  %s967_s14 = sphi %s1004_s14, %s15_s14   ;;  %s963_s13 = sphi %s1002_s13, %s1311_s13   ;;  %s959_s12 = sphi %s1000_s12, %s1310_s12   ;;  %s955_s11 = sphi %s998_s11, %s1309_s11   ;;  %s951_s10 = sphi %s996_s10, %s1308_s10   ;;  %s947_s9 = sphi %s994_s9, %s1307_s9  }
   0x5   : > { %s27_s17 = sadd.s32 1, %s963_s13  ;;  %s88_s18 = sadd.s32 1, %s955_s11 }
   0x6   : > { %p29_p0 = scmp.ge.s32.totalorder %s27_s17, 2  ;;  %p98_p1 = scmp.ne.s32.totalorder %s955_s11, %s951_s10 }
   0x7   : > { %p99_p2 = scmp.eq.s32.totalorder %s719_s15, 1  ;;  %p104_p3 = scmp.ne.s32.totalorder %s951_s10, %s947_s9 }
   0x8   : > { %s1313_s17 = smov (%p29_p0, %s27_s17), 0  ;;  %p105_p5 = scmp.eq.s32.totalorder %s720_s16, 1 }
   0x9   : > { %p1034_p4 = por %p99_p2, %p98_p1  ;;  %s83_s20 = ssub.s32 %s963_s13, %s1313_s17 }
   0xa   : > { %p724_p6 = scmp.ge.s32.totalorder %s967_s14, 1  ;;  %p86_p7 = scmp.eq.s32.totalorder %s83_s20, 0 }
   0xb   : > { %p1041_p8 = por %p105_p5, %p104_p3  ;;  %p139_p9 = scmp.lt.s32.totalorder %s967_s14, 3 }
   0xc   : > { %s1047_s22 = scalar_select %p86_p7, %s955_s11, %s88_s18  }
   0xd   : > { %p140_p10 = pnand %p724_p6, %p139_p9 }
   0xe   : > { %s726_s23 = sshll.u32 (!%p140_p10), %s959_s12, 3  ;;  %v969_v0 = vmov (!%p140_p10), 0   ;;  %v970_v9 = vmov (!%p140_p10), 1   ;;  %v971_v10 = vmov (!%p140_p10), 2   ;;  %v972_v11 = vmov (!%p140_p10), 3   ;;  %s162_s28 = sand.u32 (!%p140_p10), 1, %s951_s10  }
   0xf   : > { %143 = sbr.rel (%p140_p10) target bundleno = 270 (0x10e), region = 28  ;;  %830 = vset.pattern.permute.xlu1 (!%p140_p10), %v969_v0  ;;  %829 = vset.pattern.permute.xlu0 (!%p140_p10), %v969_v0  ;;  %p166_p11 = scmp.lt.s32.totalorder (!%p140_p10), %s726_s23, 15  ;;  %v225_v16 = vlaneseq (!%p140_p10)  ;;  %v1060_v23 = vld [vmem:[%s1303_s1] sm:$0xf] (!%p140_p10) }
  0x10   : > { %s725_s3 = sshll.u32 (!%p140_p10), %s162_s28, 8  ;;  %s589_s5 = scalar_lea.sflag (!%p140_p10), [#allocation3], %s162_s28 }
  0x11   : > { %v1054_v19 = vshrl.u32 (!%p140_p10), %v225_v16, 7  ;;  %s1197_s4 = scalar_lea.vmem (!%p140_p10), [#allocation2], %s725_s3 }
  0x13   : > { %v227_v22 = vsub.s32 (!%p140_p10), 0, %v1054_v19  ;;  %v295_v31 = vsub.s32 (!%p140_p10), 1, %v1054_v19  ;;  %v363_v45 = vsub.s32 (!%p140_p10), 2, %v1054_v19 }
  0x15   : > { %v228_v26 = vrot.slane (!%p140_p10), %v1060_v23, %v227_v22  ;;  %v296_v40 = vrot.slane (!%p140_p10), %v1060_v23, %v295_v31  ;;  %v1067_v56 = vrot.slane (!%p140_p10), %v1060_v23, %v363_v45 }
  0x16   : > { %s1315_s23 = smov (!%p166_p11, %s726_s23), 15 }
  0x17   : > { %s727_s24 = sshll.u32 %s1315_s23, 3 }
  0x18   : > { %s169_s27 = scalar_lea.vmem %s1302_s0, %s727_s24 }
  0x19   : > { %v178_v1 = vld [vmem:[%s169_s27 + $0x10] sm:$0xff]  ;;  %v176_v2 = vld [vmem:[%s169_s27] sm:$0xff]  ;;  %v179_v3 = vld [vmem:[%s169_s27 + $0x18] sm:$0xff] }
  0x1a   : > { %197 = vperm.xlu1 %830, %v178_v1   ;;  %187 = vperm.xlu0 %829, %v176_v2   ;;  %v177_v4 = vld [vmem:[%s169_s27 + $0x8] sm:$0xff]  ;;  %v180_v6 = vld [vmem:[%s169_s27 + $0x20] sm:$0xff]  ;;  %v183_v7 = vld [vmem:[%s169_s27 + $0x38] sm:$0xff] }
  0x1b   : > { %v181_v5 = vld [vmem:[%s169_s27 + $0x28] sm:$0xff]  ;;  %v182_v8 = vld [vmem:[%s169_s27 + $0x30] sm:$0xff] }
  0x1e   : > { %202 = vperm.xlu1 %830, %v179_v3   ;;  %192 = vperm.xlu0 %829, %v177_v4  }
  0x22   : > { %212 = vperm.xlu1 %830, %v181_v5   ;;  %207 = vperm.xlu0 %829, %v180_v6  }
  0x26   : > { %222 = vperm.xlu1 %830, %v183_v7   ;;  %217 = vperm.xlu0 %829, %v182_v8  }
  0x2a   : > { %832 = vset.pattern.permute.xlu1 %v970_v9  ;;  %831 = vset.pattern.permute.xlu0 %v970_v9 }
  0x2b   : > { %266 = vperm.xlu1 %832, %v177_v4   ;;  %262 = vperm.xlu0 %831, %v176_v2  }
  0x2f   : > { %270 = vperm.xlu1 %832, %v178_v1   ;;  %274 = vperm.xlu0 %831, %v179_v3  }
  0x33   : > { %278 = vperm.xlu1 %832, %v180_v6   ;;  %282 = vperm.xlu0 %831, %v181_v5  }
  0x37   : > { %286 = vperm.xlu1 %832, %v182_v8   ;;  %290 = vperm.xlu0 %831, %v183_v7  }
  0x3b   : > { %833 = vset.pattern.permute.xlu1 %v971_v10  ;;  %834 = vset.pattern.permute.xlu0 %v971_v10  ;;  %v431_v10 = vsub.s32 3, %v1054_v19 }
  0x3c   : > { %330 = vperm.xlu1 %833, %v176_v2   ;;  %334 = vperm.xlu0 %834, %v177_v4  }
  0x40   : > { %338 = vperm.xlu1 %833, %v178_v1   ;;  %346 = vperm.xlu0 %834, %v180_v6  }
  0x44   : > { %342 = vperm.xlu1 %833, %v179_v3   ;;  %354 = vperm.xlu0 %834, %v182_v8  }
  0x48   : > { %350 = vperm.xlu1 %833, %v181_v5   ;;  %835 = vset.pattern.permute.xlu0 %v972_v11 }
  0x49   : > { %398 = vperm.xlu0 %835, %v176_v2  }
  0x4c   : > { %358 = vperm.xlu1 %833, %v183_v7  }
  0x4d   : > { %410 = vperm.xlu0 %835, %v179_v3  }
  0x50   : > { %836 = vset.pattern.permute.xlu1 %v972_v11 }
  0x51   : > { %402 = vperm.xlu1 %836, %v177_v4   ;;  %418 = vperm.xlu0 %835, %v181_v5  }
  0x55   : > { %406 = vperm.xlu1 %836, %v178_v1   ;;  %426 = vperm.xlu0 %835, %v183_v7  }
  0x59   : > { %414 = vperm.xlu1 %836, %v180_v6  }
  0x5d   : > { %422 = vperm.xlu1 %836, %v182_v8  }
  0x99   : > { %v198_v12 = vpop.permute.xlu1 %197  ;;  %v188_v13 = vpop.permute.xlu0 %187 }
  0x9a   : > { %v231_v29 = vadd.f32 %v228_v26, %v198_v12  ;;  %v229_v30 = vadd.f32 %v228_v26, %v188_v13 }
  0x9c   : > { %v239_v36 = vmax.f32 %v231_v29, 0.0  ;;  %v237_v38 = vmax.f32 %v229_v30, 0.0 }
  0x9d   : > { %v203_v14 = vpop.permute.xlu1 %202  ;;  %v193_v15 = vpop.permute.xlu0 %192 }
  0x9e   : > { %v232_v34 = vadd.f32 %v228_v26, %v203_v14  ;;  %v230_v35 = vadd.f32 %v228_v26, %v193_v15  ;;  %v249_v47 = vmul.f32 1.442695, %v239_v36  ;;  %v245_v50 = vmul.f32 1.442695, %v237_v38 }
  0xa0   : > { %v240_v43 = vmax.f32 %v232_v34, 0.0  ;;  %v238_v46 = vmax.f32 %v230_v35, 0.0  ;;  %837 = vpow2.f32 %v249_v47 }
  0xa1   : > { %v213_v17 = vpop.permute.xlu1 %212  ;;  %v208_v18 = vpop.permute.xlu0 %207  ;;  %839 = vpow2.f32 %v245_v50 }
  0xa2   : > { %v234_v37 = vadd.f32 %v228_v26, %v213_v17  ;;  %v233_v39 = vadd.f32 %v228_v26, %v208_v18  ;;  %v251_v53 = vmul.f32 1.442695, %v240_v43  ;;  %v247_v59 = vmul.f32 1.442695, %v238_v46 }
  0xa4   : > { %v242_v48 = vmax.f32 %v234_v37, 0.0  ;;  %v241_v51 = vmax.f32 %v233_v39, 0.0  ;;  %841 = vpow2.f32 %v251_v53 }
  0xa5   : > { %v223_v20 = vpop.permute.xlu1 %222  ;;  %v218_v21 = vpop.permute.xlu0 %217  ;;  %843 = vpow2.f32 %v247_v59 }
  0xa6   : > { %v236_v44 = vadd.f32 %v228_v26, %v223_v20  ;;  %v235_v49 = vadd.f32 %v228_v26, %v218_v21  ;;  %v255_v61 = vmul.f32 1.442695, %v242_v48  ;;  %v253_v0 = vmul.f32 1.442695, %v241_v51 }
  0xa8   : > { %v244_v54 = vmax.f32 %v236_v44, 0.0  ;;  %v243_v62 = vmax.f32 %v235_v49, 0.0  ;;  %845 = vpow2.f32 %v255_v61 }
  0xa9   : > { %847 = vpow2.f32 %v253_v0 }
  0xaa   : > { %v267_v24 = vpop.permute.xlu1 %266  ;;  %v263_v25 = vpop.permute.xlu0 %262  ;;  %v259_v3 = vmul.f32 1.442695, %v244_v54  ;;  %v257_v11 = vmul.f32 1.442695, %v243_v62 }
  0xab   : > { %v298_v52 = vadd.f32 %v296_v40, %v267_v24  ;;  %v297_v55 = vadd.f32 %v296_v40, %v263_v25  ;;  %v1080_v31 = vpop.eup %837 }
  0xac   : > { %849 = vpow2.f32 %v259_v3  ;;  %v1082_v34 = vpop.eup %839 }
  0xad   : > { %v306_v1 = vmax.f32 %v298_v52, 0.0  ;;  %v305_v4 = vmax.f32 %v297_v55, 0.0  ;;  %851 = vpow2.f32 %v257_v11 }
  0xae   : > { %v271_v27 = vpop.permute.xlu1 %270  ;;  %v275_v28 = vpop.permute.xlu0 %274 }
  0xaf   : > { %v299_v60 = vadd.f32 %v296_v40, %v271_v27  ;;  %v300_v63 = vadd.f32 %v296_v40, %v275_v28  ;;  %v315_v14 = vmul.f32 1.442695, %v306_v1  ;;  %v313_v16 = vmul.f32 1.442695, %v305_v4 }
  0xb0   : > { %v1077_v27 = vrot.slane %v1060_v23, %v431_v10  ;;  %v1085_v23 = vpop.eup %841 }
  0xb1   : > { %v307_v8 = vmax.f32 %v299_v60, 0.0  ;;  %v308_v12 = vmax.f32 %v300_v63, 0.0  ;;  %853 = vpow2.f32 %v315_v14 }
  0xb2   : > { %v279_v32 = vpop.permute.xlu1 %278  ;;  %v283_v33 = vpop.permute.xlu0 %282  ;;  %855 = vpow2.f32 %v313_v16 }
  0xb3   : > { %v301_v2 = vadd.f32 %v296_v40, %v279_v32  ;;  %v302_v9 = vadd.f32 %v296_v40, %v283_v33  ;;  %v317_v21 = vmul.f32 1.442695, %v307_v8  ;;  %v319_v19 = vmul.f32 1.442695, %v308_v12 }
  0xb5   : > { %v309_v15 = vmax.f32 %v301_v2, 0.0  ;;  %v310_v22 = vmax.f32 %v302_v9, 0.0  ;;  %857 = vpow2.f32 %v317_v21 }
  0xb6   : > { %v287_v41 = vpop.permute.xlu1 %286  ;;  %v291_v42 = vpop.permute.xlu0 %290  ;;  %859 = vpow2.f32 %v319_v19 }
  0xb7   : > { %v303_v13 = vadd.f32 %v296_v40, %v287_v41  ;;  %v304_v24 = vadd.f32 %v296_v40, %v291_v42  ;;  %v321_v28 = vmul.f32 1.442695, %v309_v15  ;;  %v323_v35 = vmul.f32 1.442695, %v310_v22  ;;  %v1088_v41 = vpop.eup %843 }
  0xb8   : > { %v1091_v45 = vpop.eup %845 }
  0xb9   : > { %v311_v26 = vmax.f32 %v303_v13, 0.0  ;;  %v312_v36 = vmax.f32 %v304_v24, 0.0  ;;  %861 = vpow2.f32 %v321_v28  ;;  %v1093_v48 = vpop.eup %847 }
  0xba   : > { %v1095_v52 = vpop.eup %849 }
  0xbb   : > { %v331_v57 = vpop.permute.xlu1 %330  ;;  %v335_v58 = vpop.permute.xlu0 %334  ;;  %v325_v39 = vmul.f32 1.442695, %v311_v26  ;;  %v327_v49 = vmul.f32 1.442695, %v312_v36 }
  0xbc   : > { %v365_v5 = vadd.f32 %v1067_v56, %v331_v57  ;;  %v366_v29 = vadd.f32 %v1067_v56, %v335_v58  ;;  %v1101_v60 = vpop.eup %851 }
  0xbd   : > { %v1103_v62 = vpop.eup %853 }
  0xbe   : > { %v373_v17 = vmax.f32 %v365_v5, 0.0  ;;  %v374_v42 = vmax.f32 %v366_v29, 0.0  ;;  %v1105_v2 = vpop.eup %855 }
  0xbf   : > { %v339_v6 = vpop.permute.xlu1 %338  ;;  %v1070_v7 = vpop.permute.xlu0 %346  ;;  %v465_v15 = vadd.f32 %v1105_v2, %v1082_v34 }
  0xc0   : > { %v381_v32 = vmul.f32 1.442695, %v373_v17  ;;  %v367_v43 = vadd.f32 %v1067_v56, %v339_v6  ;;  %v383_v57 = vmul.f32 1.442695, %v374_v42  ;;  %v369_v59 = vadd.f32 %v1067_v56, %v1070_v7  ;;  %v1109_v7 = vpop.eup %857 }
  0xc1   : > { %v1113_v11 = vpop.eup %859 }
  0xc2   : > { %863 = vpow2.f32 %v381_v32  ;;  %v375_v58 = vmax.f32 %v367_v43, 0.0  ;;  %v377_v9 = vmax.f32 %v369_v59, 0.0 }
  0xc3   : > { %v343_v18 = vpop.permute.xlu1 %342  ;;  %v1073_v20 = vpop.permute.xlu0 %354  ;;  %865 = vpow2.f32 %v323_v35 }
  0xc4   : > { %v368_v25 = vadd.f32 %v1067_v56, %v343_v18  ;;  %867 = vpow2.f32 %v325_v39  ;;  %v385_v8 = vmul.f32 1.442695, %v375_v58  ;;  %v371_v10 = vadd.f32 %v1067_v56, %v1073_v20  ;;  %v1115_v14 = vpop.eup %861 }
  0xc6   : > { %v376_v30 = vmax.f32 %v368_v25, 0.0  ;;  %v389_v25 = vmul.f32 1.442695, %v377_v9  ;;  %v379_v19 = vmax.f32 %v371_v10, 0.0 }
  0xc7   : > { %v351_v33 = vpop.permute.xlu1 %350 }
  0xc8   : > { %v370_v37 = vadd.f32 %v1067_v56, %v351_v33  ;;  %v399_v38 = vpop.permute.xlu0 %398  ;;  %v387_v44 = vmul.f32 1.442695, %v376_v30  ;;  %v393_v42 = vmul.f32 1.442695, %v379_v19 }
  0xc9   : > { %v433_v40 = vadd.f32 %v1077_v27, %v399_v38 }
  0xca   : > { %v378_v50 = vmax.f32 %v370_v37, 0.0  ;;  %869 = vpow2.f32 %v387_v44  ;;  %v468_v37 = vadd.f32 %v1113_v11, %v1085_v23 }
  0xcb   : > { %v441_v46 = vmax.f32 %v433_v40, 0.0  ;;  %v359_v47 = vpop.permute.xlu1 %358 }
  0xcc   : > { %v411_v51 = vpop.permute.xlu0 %410  ;;  %v372_v54 = vadd.f32 %v1067_v56, %v359_v47  ;;  %v391_v63 = vmul.f32 1.442695, %v378_v50  ;;  %v1119_v18 = vpop.eup %863 }
  0xcd   : > { %v449_v53 = vmul.f32 1.442695, %v441_v46  ;;  %v436_v55 = vadd.f32 %v1077_v27, %v411_v51  ;;  %v1122_v20 = vpop.eup %865  ;;  %v473_v32 = vadd.f32 %v1119_v18, %v465_v15 }
  0xce   : > { %v380_v3 = vmax.f32 %v372_v54, 0.0  ;;  %v1125_v28 = vpop.eup %867  ;;  %v470_v59 = vadd.f32 %v1122_v20, %v1091_v45 }
  0xcf   : > { %871 = vpow2.f32 %v449_v53  ;;  %v444_v61 = vmax.f32 %v436_v55, 0.0 }
  0xd0   : > { %873 = vpow2.f32 %v327_v49  ;;  %v403_v0 = vpop.permute.xlu1 %402  ;;  %v419_v1 = vpop.permute.xlu0 %418  ;;  %v395_v21 = vmul.f32 1.442695, %v380_v3 }
  0xd1   : > { %v455_v4 = vmul.f32 1.442695, %v444_v61  ;;  %v434_v5 = vadd.f32 %v1077_v27, %v403_v0  ;;  %v438_v6 = vadd.f32 %v1077_v27, %v419_v1  ;;  %875 = vpow2.f32 %v383_v57 }
  0xd2   : > { %v466_v57 = vadd.f32 %v1103_v62, %v1088_v41 }
  0xd3   : > { %877 = vpow2.f32 %v455_v4  ;;  %v442_v12 = vmax.f32 %v434_v5, 0.0  ;;  %v446_v13 = vmax.f32 %v438_v6, 0.0  ;;  %v467_v5 = vadd.f32 %v1109_v7, %v1080_v31 }
  0xd4   : > { %879 = vpow2.f32 %v391_v63  ;;  %v407_v16 = vpop.permute.xlu1 %406  ;;  %v427_v17 = vpop.permute.xlu0 %426 }
  0xd5   : > { %v451_v22 = vmul.f32 1.442695, %v442_v12  ;;  %v459_v24 = vmul.f32 1.442695, %v446_v13  ;;  %v435_v56 = vadd.f32 %v1077_v27, %v407_v16  ;;  %881 = vpow2.f32 %v385_v8  ;;  %v1127_v30 = vpop.eup %869 }
  0xd6   : > { %v440_v26 = vadd.f32 %v1077_v27, %v427_v17  ;;  %v476_v49 = vadd.f32 %v1127_v30, %v468_v37  ;;  %v469_v17 = vadd.f32 %v1115_v14, %v1093_v48 }
  0xd7   : > { %883 = vpow2.f32 %v451_v22  ;;  %v443_v29 = vmax.f32 %v435_v56, 0.0 }
  0xd8   : > { %885 = vpow2.f32 %v459_v24  ;;  %v448_v33 = vmax.f32 %v440_v26, 0.0  ;;  %v415_v35 = vpop.permute.xlu1 %414 }
  0xd9   : > { %v1130_v36 = vpop.eup %871  ;;  %887 = vpow2.f32 %v395_v21  ;;  %v453_v38 = vmul.f32 1.442695, %v443_v29  ;;  %v437_v39 = vadd.f32 %v1077_v27, %v415_v35  ;;  %v471_v35 = vadd.f32 %v1125_v28, %v1101_v60 }
  0xda   : > { %v1135_v40 = vpop.eup %873  ;;  %889 = vpow2.f32 %v389_v25  ;;  %v481_v43 = vadd.f32 %v1130_v36, %v473_v32  ;;  %v463_v44 = vmul.f32 1.442695, %v448_v33 }
  0xdb   : > { %891 = vpow2.f32 %v453_v38  ;;  %v445_v46 = vmax.f32 %v437_v39, 0.0  ;;  %v1138_v47 = vpop.eup %875  ;;  %v472_v12 = vadd.f32 %v1135_v40, %v1095_v52 }
  0xdc   : > { %893 = vrcp.f32 %v481_v43  ;;  %v423_v50 = vpop.permute.xlu1 %422  ;;  %v474_v0 = vadd.f32 %v1138_v47, %v466_v57 }
  0xdd   : > { %v1141_v51 = vpop.eup %877  ;;  %895 = vpow2.f32 %v463_v44  ;;  %v457_v53 = vmul.f32 1.442695, %v445_v46  ;;  %v439_v54 = vadd.f32 %v1077_v27, %v423_v50 }
  0xde   : > { %v1144_v55 = vpop.eup %879  ;;  %897 = vpow2.f32 %v393_v42  ;;  %v484_v58 = vadd.f32 %v1141_v51, %v476_v49 }
  0xdf   : > { %899 = vpow2.f32 %v457_v53  ;;  %v447_v61 = vmax.f32 %v439_v54, 0.0  ;;  %v1151_v63 = vpop.eup %881  ;;  %v478_v27 = vadd.f32 %v1144_v55, %v470_v59 }
  0xe0   : > { %901 = vrcp.f32 %v484_v58  ;;  %v475_v13 = vadd.f32 %v1151_v63, %v467_v5 }
  0xe1   : > { %v1154_v1 = vpop.eup %883  ;;  %v461_v3 = vmul.f32 1.442695, %v447_v61 }
  0xe2   : > { %v1157_v4 = vpop.eup %885  ;;  %v482_v6 = vadd.f32 %v1154_v1, %v474_v0 }
  0xe3   : > { %v1162_v8 = vpop.eup %887  ;;  %v486_v9 = vadd.f32 %v1157_v4, %v478_v27  ;;  %903 = vpow2.f32 %v461_v3 }
  0xe4   : > { %v1165_v10 = vpop.eup %889  ;;  %905 = vrcp.f32 %v482_v6  ;;  %v480_v21 = vadd.f32 %v1162_v8, %v472_v12 }
  0xe5   : > { %v1170_v15 = vpop.eup %891  ;;  %907 = vrcp.f32 %v486_v9  ;;  %v477_v19 = vadd.f32 %v1165_v10, %v469_v17 }
  0xe6   : > { %v894_v16 = vpop.eup %893  ;;  %v483_v22 = vadd.f32 %v1170_v15, %v475_v13 }
  0xe7   : > { %v1176_v24 = vpop.eup %895  ;;  %v497_v56 = vmul.f32 %v894_v16, %v481_v43 }
  0xe8   : > { %v1178_v25 = vpop.eup %897  ;;  %909 = vrcp.f32 %v483_v22  ;;  %v488_v26 = vadd.f32 %v1176_v24, %v480_v21 }
  0xe9   : > { %v1182_v29 = vpop.eup %899  ;;  %v505_v32 = vsub.f32 2.0, %v497_v56  ;;  %v479_v42 = vadd.f32 %v1178_v25, %v471_v35 }
  0xea   : > { %v902_v33 = vpop.eup %901  ;;  %911 = vrcp.f32 %v488_v26  ;;  %v485_v37 = vadd.f32 %v1182_v29, %v477_v19 }
  0xeb   : > { %v513_v38 = vmul.f32 %v894_v16, %v505_v32  ;;  %v500_v39 = vmul.f32 %v902_v33, %v484_v58 }
  0xec   : > { %913 = vrcp.f32 %v485_v37 }
  0xed   : > { %v1190_v43 = vpop.eup %903  ;;  %v521_v44 = vmul.f32 %v1082_v34, %v513_v38  ;;  %v537_v46 = vmul.f32 %v1105_v2, %v513_v38  ;;  %v554_v49 = vmul.f32 %v1119_v18, %v513_v38  ;;  %v571_v50 = vmul.f32 %v1130_v36, %v513_v38 }
  0xee   : > { %v906_v53 = vpop.eup %905  ;;  %v508_v54 = vsub.f32 2.0, %v500_v39  ;;  %v487_v57 = vadd.f32 %v1190_v43, %v479_v42 }
  0xef   : > { %v908_v59 = vpop.eup %907  ;;  %529 = vst [vmem:[%s1197_s4] sm:$0xff] %v521_v44  ;;  %728 = vst [vmem:[%s1197_s4 + $0x40] sm:$0xff] %v537_v46  ;;  %v498_v34 = vmul.f32 %v906_v53, %v482_v6 }
  0xf0   : > { %736 = vst [vmem:[%s1197_s4 + $0x80] sm:$0xff] %v554_v49  ;;  %744 = vst [vmem:[%s1197_s4 + $0xc0] sm:$0xff] %v571_v50  ;;  %v516_v2 = vmul.f32 %v902_v33, %v508_v54  ;;  %v502_v18 = vmul.f32 %v908_v59, %v486_v9  ;;  %915 = vrcp.f32 %v487_v57 }
  0xf1   : > { %v506_v36 = vsub.f32 2.0, %v498_v34 }
  0xf2   : > { %v910_v58 = vpop.eup %909  ;;  %v524_v61 = vmul.f32 %v1085_v23, %v516_v2  ;;  %v540_v0 = vmul.f32 %v1113_v11, %v516_v2  ;;  %v557_v27 = vmul.f32 %v1127_v30, %v516_v2  ;;  %v574_v3 = vmul.f32 %v1141_v51, %v516_v2 }
  0xf3   : > { %v514_v5 = vmul.f32 %v906_v53, %v506_v36  ;;  %v510_v12 = vsub.f32 2.0, %v502_v18  ;;  %v499_v6 = vmul.f32 %v910_v58, %v483_v22 }
  0xf4   : > { %v912_v13 = vpop.eup %911  ;;  %532 = vst [vmem:[%s1197_s4 + $0x18] sm:$0xff] %v524_v61  ;;  %731 = vst [vmem:[%s1197_s4 + $0x58] sm:$0xff] %v540_v0 }
  0xf5   : > { %739 = vst [vmem:[%s1197_s4 + $0x98] sm:$0xff] %v557_v27  ;;  %747 = vst [vmem:[%s1197_s4 + $0xd8] sm:$0xff] %v574_v3  ;;  %v522_v23 = vmul.f32 %v1088_v41, %v514_v5  ;;  %v538_v11 = vmul.f32 %v1103_v62, %v514_v5  ;;  %v555_v30 = vmul.f32 %v1138_v47, %v514_v5  ;;  %v507_v17 = vsub.f32 2.0, %v499_v6 }
  0xf6   : > { %v572_v51 = vmul.f32 %v1154_v1, %v514_v5  ;;  %v914_v9 = vpop.eup %913  ;;  %v518_v16 = vmul.f32 %v908_v59, %v510_v12  ;;  %v504_v21 = vmul.f32 %v912_v13, %v488_v26 }
  0xf7   : > { %530 = vst [vmem:[%s1197_s4 + $0x8] sm:$0xff] %v522_v23  ;;  %729 = vst [vmem:[%s1197_s4 + $0x48] sm:$0xff] %v538_v11  ;;  %v501_v22 = vmul.f32 %v914_v9, %v485_v37  ;;  %v515_v56 = vmul.f32 %v910_v58, %v507_v17 }
  0xf8   : > { %737 = vst [vmem:[%s1197_s4 + $0x88] sm:$0xff] %v555_v30  ;;  %745 = vst [vmem:[%s1197_s4 + $0xc8] sm:$0xff] %v572_v51  ;;  %v526_v41 = vmul.f32 %v1091_v45, %v518_v16  ;;  %v542_v62 = vmul.f32 %v1122_v20, %v518_v16  ;;  %v559_v47 = vmul.f32 %v1144_v55, %v518_v16  ;;  %v512_v19 = vsub.f32 2.0, %v504_v21 }
  0xf9   : > { %v576_v1 = vmul.f32 %v1157_v4, %v518_v16  ;;  %v509_v26 = vsub.f32 2.0, %v501_v22  ;;  %v523_v45 = vmul.f32 %v1080_v31, %v515_v56  ;;  %v539_v20 = vmul.f32 %v1109_v7, %v515_v56 }
  0xfa   : > { %v916_v32 = vpop.eup %915  ;;  %534 = vst [vmem:[%s1197_s4 + $0x28] sm:$0xff] %v526_v41  ;;  %733 = vst [vmem:[%s1197_s4 + $0x68] sm:$0xff] %v542_v62  ;;  %v556_v55 = vmul.f32 %v1151_v63, %v515_v56  ;;  %v573_v4 = vmul.f32 %v1170_v15, %v515_v56  ;;  %v520_v33 = vmul.f32 %v912_v13, %v512_v19 }
  0xfb   : > { %741 = vst [vmem:[%s1197_s4 + $0xa8] sm:$0xff] %v559_v47  ;;  %749 = vst [vmem:[%s1197_s4 + $0xe8] sm:$0xff] %v576_v1  ;;  %v517_v35 = vmul.f32 %v914_v9, %v509_v26  ;;  %v503_v37 = vmul.f32 %v916_v32, %v487_v57 }
  0xfc   : > { %531 = vst [vmem:[%s1197_s4 + $0x10] sm:$0xff] %v523_v45  ;;  %730 = vst [vmem:[%s1197_s4 + $0x50] sm:$0xff] %v539_v20  ;;  %v528_v31 = vmul.f32 %v1095_v52, %v520_v33  ;;  %v544_v7 = vmul.f32 %v1135_v40, %v520_v33  ;;  %v561_v63 = vmul.f32 %v1162_v8, %v520_v33 }
  0xfd   : > { %738 = vst [vmem:[%s1197_s4 + $0x90] sm:$0xff] %v556_v55  ;;  %746 = vst [vmem:[%s1197_s4 + $0xd0] sm:$0xff] %v573_v4  ;;  %v578_v15 = vmul.f32 %v1176_v24, %v520_v33  ;;  %v525_v38 = vmul.f32 %v1093_v48, %v517_v35  ;;  %v541_v39 = vmul.f32 %v1115_v14, %v517_v35  ;;  %v511_v52 = vsub.f32 2.0, %v503_v37 }
  0xfe   : > { %v558_v42 = vmul.f32 %v1165_v10, %v517_v35  ;;  %v575_v44 = vmul.f32 %v1182_v29, %v517_v35  ;;  %536 = vst [vmem:[%s1197_s4 + $0x38] sm:$0xff] %v528_v31  ;;  %735 = vst [vmem:[%s1197_s4 + $0x78] sm:$0xff] %v544_v7 }
  0xff   : > { %743 = vst [vmem:[%s1197_s4 + $0xb8] sm:$0xff] %v561_v63  ;;  %751 = vst [vmem:[%s1197_s4 + $0xf8] sm:$0xff] %v578_v15  ;;  %v519_v48 = vmul.f32 %v916_v32, %v511_v52 }
 0x100   : > { %533 = vst [vmem:[%s1197_s4 + $0x20] sm:$0xff] %v525_v38  ;;  %732 = vst [vmem:[%s1197_s4 + $0x60] sm:$0xff] %v541_v39 }
 0x101   : > { %740 = vst [vmem:[%s1197_s4 + $0xa0] sm:$0xff] %v558_v42  ;;  %748 = vst [vmem:[%s1197_s4 + $0xe0] sm:$0xff] %v575_v44  ;;  %v527_v14 = vmul.f32 %v1101_v60, %v519_v48  ;;  %v543_v40 = vmul.f32 %v1125_v28, %v519_v48  ;;  %v560_v8 = vmul.f32 %v1178_v25, %v519_v48 }
 0x102   : > { %v577_v10 = vmul.f32 %v1190_v43, %v519_v48 }
 0x103   : > { %535 = vst [vmem:[%s1197_s4 + $0x30] sm:$0xff] %v527_v14  ;;  %734 = vst [vmem:[%s1197_s4 + $0x70] sm:$0xff] %v543_v40 }
 0x104   : > { %742 = vst [vmem:[%s1197_s4 + $0xb0] sm:$0xff] %v560_v8  ;;  %750 = vst [vmem:[%s1197_s4 + $0xf0] sm:$0xff] %v577_v10 }
 0x105   : > { %s757_s6 = sshll.u32 %s959_s12, 10  ;;  %s619_s7 = sshll.u32 %s1197_s4, 4  ;;  %s620_s7 = int_to_ptr.vmem [resolvable:$true] %s619_s7 }
 0x106   : > { %s602_s16 = scalar_lea.hbm %s1304_s2, %s757_s6  ;;  %s973_s18 = smov 1024  }
 0x107   : > { %758 = sst [smem:[#allocation5]] (%p1034_p4), %s973_s18  ;;  %s974_s20 = smov 2048  }
 0x108   : > { %759 = sst [smem:[#allocation5 + $0x1]] (%p1034_p4), %s974_s20  ;;  %s975_s23 = smov 8  }
 0x109   : > { %760 = sst [smem:[#allocation5 + $0x2]] (%p1034_p4), %s975_s23  ;;  %s976_s24 = smov 128  }
 0x10a   : > { %761 = sst [smem:[#allocation5 + $0x3]] (%p1034_p4), %s976_s24  ;;  %s977_s12 = smov [#allocation4]  }
 0x10b   : > { %762 = sst [smem:[#allocation5 + $0x4]] (%p1034_p4), %s976_s24  ;;  %s978_s25 = smov 0  }
 0x10c   : > { %763 = sst [smem:[#allocation5 + $0x5]] (%p1034_p4), %s975_s23 }
 0x10d   : > { %764 = dma.general (%p1034_p4), %s620_s7, 4096, %s602_s16, %s589_s5, %s977_s12, [#allocation5], %s978_s25, 0  }
 0x10e PF: > { %p770_p12 = scmp.ge.s32.totalorder %s967_s14, 2  ;;  %s647_s26 = sand.u32 1, %s947_s9  }
 0x10f   : > { %s648_s27 = scalar_lea.sflag [#allocation3], %s647_s26 }
 0x110   : > { %p767_p13 = pnand %p770_p12, %p1041_p8 }
 0x112   : > { %942 = dma.done.wait (!%p767_p13), %s648_s27, 4096  }
 0x113   : > { %944 = vsyncadd (!%p767_p13), %s648_s27, 4294963200  ;;  %s15_s14 = sadd.s32 1, %s967_s14   ;;  %s1307_s9 = smov %s951_s10 }
 0x114   : > { %p12_p0 = scmp.ge.s32.totalorder %s15_s14, 4   ;;  %s1308_s10 = smov %s955_s11 }
 0x115   : > { %s1309_s11 = smov %s1047_s22  ;;  %s1310_s12 = smov %s963_s13 }
 0x116   : > { %s1311_s13 = smov %s1313_s17  ;;  %14 = sbr.rel (!%p12_p0) target bundleno = 4 (0x4), region = 74 }
 0x11d   :  { %653 = vsyncpa [#allocation3], 1 }
 0x11e   :  { %655 = vsyncpa [#allocation3 + $0x1], 1 }

</bundles_post_ra>
